<compile_context>
chip_gen: v7x
topology: tpu7x:2x2x1
jax: 0.10.0
libtpu: 0.0.40
codegen_flags: <defaults>
</compile_context>

<pallas_src>
import jax
import jax.numpy as jnp
from jax.experimental import pallas as pl
from jax.experimental.pallas import tpu as pltpu


# ------------------------------ Pallas kernel ------------------------------ #

def _detect_1x1_kernel(x_ref, w_ref, b_ref, o_ref):
    # x_ref: (1, Cin, TC)  -- TC flattened spatial columns of one image
    # w_ref: (Cout, Cin)
    # b_ref: (Cout, 1)
    # o_ref: (1, Cout, TC)
    y = jnp.dot(w_ref[...], x_ref[0], preferred_element_type=jnp.float32)
    y = y + b_ref[...]                       # broadcast bias over lanes
    o_ref[0] = y.astype(o_ref.dtype)


# ------------------------------ Wrapper ------------------------------------ #

def _pick_col_tile(cols, cin, itemsize, max_block_bytes=4 * 1024 * 1024):
    """Largest lane-aligned (multiple-of-128) divisor of `cols` whose input
    block stays within ~max_block_bytes; full extent if `cols` is small."""
    cap = max(128, max_block_bytes // max(1, cin * itemsize))
    if cols <= cap:
        return cols                      # full-extent block is always legal
    t = (min(cap, cols) // 128) * 128
    while t >= 128:
        if cols % t == 0:
            return t
        t -= 128
    return cols                          # fallback: no aligned divisor found


def detect_1x1(x_nchw, w_oi, bias_col):
    """1x1 Conv2d + bias, NCHW in / NCHW out."""
    N, Cin, H, W = x_nchw.shape
    Cout = w_oi.shape[0]
    R = H * W

    x2 = x_nchw.reshape(N, Cin, R)       # contiguous reshape: metadata only
    tc = _pick_col_tile(R, Cin, x2.dtype.itemsize)
    grid = (N, R // tc)

    out = pl.pallas_call(
        _detect_1x1_kernel,
        out_shape=jax.ShapeDtypeStruct((N, Cout, R), x_nchw.dtype),
        grid=grid,
        in_specs=[
            pl.BlockSpec((1, Cin, tc), lambda n, c: (n, 0, c)),
            pl.BlockSpec((Cout, Cin), lambda n, c: (0, 0)),
            pl.BlockSpec((Cout, 1), lambda n, c: (0, 0)),
        ],
        out_specs=pl.BlockSpec((1, Cout, tc), lambda n, c: (n, 0, c)),
        compiler_params=pltpu.CompilerParams(
            dimension_semantics=("parallel", "parallel"),
            vmem_limit_bytes=32 * 1024 * 1024),
    )(x2, w_oi, bias_col)

    return out.reshape(N, Cout, H, W)


# ----------------------------- Head forward -------------------------------- #

def head_forward(features, params):
    t2, b1, b2 = features
    o1 = detect_1x1(t2, params["detect1"]["w"], params["detect1"]["b"])
    o2 = detect_1x1(b1, params["detect2"]["w"], params["detect2"]["b"])
    o3 = detect_1x1(b2, params["detect3"]["w"], params["detect3"]["b"])
    return (o1, o2, o3)


# --------------------------- Parameter setup ------------------------------- #

def init_head(key, num_classes, in_channels=(128, 256, 512)):
    names = ("detect1", "detect2", "detect3")
    keys = jax.random.split(key, len(in_channels))
    params = {}
    for name, cin, k in zip(names, in_channels, keys):
        kw, kb = jax.random.split(k)
        # PyTorch conv weight (Cout, Cin, 1, 1) squeezed to (Cout, Cin).
        w = 0.05 * jax.random.normal(kw, (num_classes, cin), jnp.float32)
        b = 0.05 * jax.random.normal(kb, (num_classes,), jnp.float32)
        params[name] = {"w": w, "b": b.reshape(-1, 1)}
    return params


# ------------------------- Pure-JAX reference ------------------------------- #

def _ref_detect(x_nchw, w_oi, b_col):
    y = jnp.einsum("nchw,oc->nohw", x_nchw, w_oi)
    return y + b_col.reshape(1, -1, 1, 1)


def head_ref(features, params):
    t2, b1, b2 = features
    return (
        _ref_detect(t2, params["detect1"]["w"], params["detect1"]["b"]),
        _ref_detect(b1, params["detect2"]["w"], params["detect2"]["b"]),
        _ref_detect(b2, params["detect3"]["w"], params["detect3"]["b"]),
    )


# ---------------------------------- Main ------------------------------------ #

if __name__ == "__main__":
    key = jax.random.PRNGKey(0)
    kx1, kx2, kx3, kp = jax.random.split(key, 4)

    N = 2
    num_classes = 8
    # Feature pyramid consistent with the module's fixed channel counts.
    t2 = jax.random.normal(kx1, (N, 128, 16, 16), jnp.float32)
    b1 = jax.random.normal(kx2, (N, 256, 8, 8), jnp.float32)
    b2 = jax.random.normal(kx3, (N, 512, 4, 4), jnp.float32)

    params = init_head(kp, num_classes)

    outs = jax.block_until_ready(head_forward((t2, b1, b2), params))
    refs = jax.block_until_ready(head_ref((t2, b1, b2), params))

    expected_shapes = [(N, num_classes, 16, 16),
                       (N, num_classes, 8, 8),
                       (N, num_classes, 4, 4)]
    for o, r, es in zip(outs, refs, expected_shapes):
        assert o.shape == es, (o.shape, es)
        assert jnp.allclose(o, r, rtol=2e-2, atol=2e-2), \
            float(jnp.max(jnp.abs(o - r)))

    print("KERNEL_OK")
</pallas_src>

<mosaic_0001>
module attributes {stable_mosaic.version = 11 : i64} {
  func.func @_detect_1x1_kernel(%arg0: i32, %arg1: i32, %arg2: memref<1x128x256xf32, #tpu.memory_space<vmem>>, %arg3: memref<8x128xf32, #tpu.memory_space<vmem>>, %arg4: memref<8x1xf32, #tpu.memory_space<vmem>>, %arg5: memref<1x8x256xf32, #tpu.memory_space<vmem>>) attributes {dimension_semantics = [#tpu.dimension_semantics<parallel>, #tpu.dimension_semantics<parallel>], iteration_bounds = array<i64: 2, 1>, scalar_prefetch = 0 : i64, scratch_operands = 0 : i64, tpu.core_type = #tpu.core_type<tc>, window_params = [{transform_indices = @transform_0, window_bounds = array<i64: 1, 128, 256>}, {pipeline_mode = #tpu.pipeline_mode<synchronous>, transform_indices = @transform_1, window_bounds = array<i64: 8, 128>}, {pipeline_mode = #tpu.pipeline_mode<synchronous>, transform_indices = @transform_2, window_bounds = array<i64: 8, 1>}, {transform_indices = @transform_3, window_bounds = array<i64: 1, 8, 256>}]} {
    %c0 = arith.constant 0 : index
    %c0_0 = arith.constant 0 : index
    %0 = vector.load %arg3[%c0, %c0_0] : memref<8x128xf32, #tpu.memory_space<vmem>>, vector<8x128xf32>
    %c0_1 = arith.constant 0 : index
    %c0_2 = arith.constant 0 : index
    %c0_3 = arith.constant 0 : index
    %1 = vector.load %arg2[%c0_1, %c0_2, %c0_3] : memref<1x128x256xf32, #tpu.memory_space<vmem>>, vector<1x128x256xf32>
    %2 = vector.shape_cast %1 : vector<1x128x256xf32> to vector<128x256xf32>
    %cst = arith.constant dense<0.000000e+00> : vector<8x256xf32>
    %3 = tpu.matmul %0, %2, %cst {dimension_numbers = #tpu.dot_dimension_numbers<[1], [0], [0], [1], [0, 0, 1, 1], [], []>} : vector<8x128xf32>, vector<128x256xf32>, vector<8x256xf32> -> vector<8x256xf32>
    %c0_4 = arith.constant 0 : index
    %c0_5 = arith.constant 0 : index
    %4 = vector.load %arg4[%c0_4, %c0_5] : memref<8x1xf32, #tpu.memory_space<vmem>>, vector<8x1xf32>
    %5 = vector.broadcast %4 : vector<8x1xf32> to vector<8x256xf32>
    %6 = arith.addf %3, %5 : vector<8x256xf32>
    %c0_6 = arith.constant 0 : index
    %c0_7 = arith.constant 0 : index
    %c0_8 = arith.constant 0 : index
    %7 = vector.load %arg5[%c0_6, %c0_7, %c0_8] : memref<1x8x256xf32, #tpu.memory_space<vmem>>, vector<1x8x256xf32>
    %8 = vector.shape_cast %7 : vector<1x8x256xf32> to vector<8x256xf32>
    %9 = vector.shape_cast %6 : vector<8x256xf32> to vector<1x8x256xf32>
    tpu.vector_store %arg5[%c0_6, %c0_7, %c0_8], %9 {strides = array<i32>} : memref<1x8x256xf32, #tpu.memory_space<vmem>>, vector<1x8x256xf32>,
    return
  }
  func.func @transform_0(%arg0: i32, %arg1: i32) -> (i32, i32, i32) {
    %c0_i32 = arith.constant 0 : i32
    %c0_i32_0 = arith.constant 0 : i32
    return %arg0, %c0_i32, %arg1 : i32, i32, i32
  }
  func.func @transform_1(%arg0: i32, %arg1: i32) -> (i32, i32) {
    %c0_i32 = arith.constant 0 : i32
    %c0_i32_0 = arith.constant 0 : i32
    %c0_i32_1 = arith.constant 0 : i32
    return %c0_i32, %c0_i32_0 : i32, i32
  }
  func.func @transform_2(%arg0: i32, %arg1: i32) -> (i32, i32) {
    %c0_i32 = arith.constant 0 : i32
    %c0_i32_0 = arith.constant 0 : i32
    %c0_i32_1 = arith.constant 0 : i32
    return %c0_i32, %c0_i32_0 : i32, i32
  }
  func.func @transform_3(%arg0: i32, %arg1: i32) -> (i32, i32, i32) {
    %c0_i32 = arith.constant 0 : i32
    %c0_i32_0 = arith.constant 0 : i32
    return %arg0, %c0_i32, %arg1 : i32, i32, i32
  }
}

</mosaic_0001>

<bundles_post_ra>
// kernel: tpu_custom_call.1
= control target key start
LH: loop header
LB: loop body
LE: loop exit
PB: predicated region body
PF: predicated region fallthrough
CT: control target
= control target key end

     0   :  { %8 = vsyncpa [#allocation3], 0  ;;  %s892_s0 = inlined_call_operand.hbm [shape: f32[2,128,256], index: 0, kind: input, shape index: {}]   ;;  %s893_s1 = inlined_call_operand.vmem [shape: f32[8,128], index: 1, kind: input, shape index: {}]   ;;  %s894_s2 = inlined_call_operand.vmem [shape: f32[8,1], index: 2, kind: input, shape index: {}]   ;;  %s895_s3 = inlined_call_operand.hbm [shape: f32[2,8,256], index: 3, kind: output, shape index: {}]  }
   0x1   :  { %10 = vsyncpa [#allocation3 + $0x1], 0 }
   0x2   :  { %11 = vsyncpa [#allocation4], 0 }
   0x3   :  { %13 = vsyncpa [#allocation4 + $0x1], 0  ;;  %s678_s12 = smov 0   ;;  %s680_s13 = smov 0  }
   0x4   :  { %s682_s14 = smov 0   ;;  %s684_s15 = smov 0  }
   0x5   :  { %s686_s16 = smov 0   ;;  %s688_s17 = smov 0  }
   0x6 LB: > { %s422_s18 = sadd.s32 4294967295, %s650_s17   ;;  %s423_s19 = sadd.s32 4294967294, %s650_s17   ;;  %s650_s17 = sphi %s688_s17, %s19_s17   ;;  %s646_s16 = sphi %s686_s16, %s910_s16   ;;  %s642_s15 = sphi %s684_s15, %s909_s15   ;;  %s638_s14 = sphi %s682_s14, %s908_s14   ;;  %s634_s13 = sphi %s680_s13, %s907_s13   ;;  %s630_s12 = sphi %s678_s12, %s906_s12  }
   0x7   : > { %s31_s20 = sadd.s32 1, %s646_s16  ;;  %s40_s21 = sadd.s32 1, %s638_s14 }
   0x8   : > { %p33_p0 = scmp.ge.s32.totalorder %s31_s20, 2  ;;  %p47_p1 = scmp.ne.s32.totalorder %s638_s14, %s634_s13 }
   0x9   : > { %p48_p2 = scmp.eq.s32.totalorder %s650_s17, 0  ;;  %p53_p3 = scmp.ne.s32.totalorder %s634_s13, %s630_s12 }
   0xa   : > { %s912_s20 = smov (%p33_p0, %s31_s20), 0  ;;  %p54_p5 = scmp.eq.s32.totalorder %s422_s18, 0 }
   0xb   : > { %p719_p4 = por %p48_p2, %p47_p1  ;;  %s35_s23 = ssub.s32 %s646_s16, %s912_s20 }
   0xc   : > { %p121_p6 = scmp.eq.s32.totalorder %s422_s18, 1  ;;  %p38_p7 = scmp.eq.s32.totalorder %s35_s23, 0 }
   0xd   : > { %p725_p8 = por %p54_p5, %p53_p3  ;;  %p127_p10 = scmp.eq.s32.totalorder %s423_s19, 1 }
   0xe   : > { %p729_p9 = por %p121_p6, %p47_p1  ;;  %p483_p13 = scmp.lt.s32.totalorder %s650_s17, 2 }
   0xf   : > { %s734_s26 = scalar_select %p38_p7, %s638_s14, %s40_s21  }
  0x10   : > { %s899_s25 = scalar_select %p729_p9, 1, 0 }
  0x11   : > { %p736_p11 = por %p127_p10, %p53_p3  ;;  %s153_s28 = sand.u32 1, %s638_s14  }
  0x12   : > { %s426_s29 = sshll.u32 %s153_s28, 8  ;;  %s437_s30 = sshll.u32 %s646_s16, 12 }
  0x13   : > { %s900_s27 = scalar_select %p736_p11, 1, 0 }
  0x14   : > { %s747_s6 = scalar_lea.hbm %s892_s0, %s437_s30  ;;  %s157_s7 = scalar_lea.vmem [#allocation2], %s426_s29 }
  0x15   : > { %s166_s8 = sshll.u32 %s157_s7, 4  ;;  %p753_p0 = pnand %p483_p13, %p719_p4  ;;  %s749_s8 = int_to_ptr.vmem [resolvable:$true] %s166_s8 }
  0x16   : > { %s758_s10 = scalar_lea.sflag [#allocation3], %s153_s28  ;;  %s538_s11 = scalar_lea.hbm %s747_s6, 4096 }
  0x17   : > { %p539_p2 = scmp.ne.s32.totalorder %s747_s6, %s538_s11  ;;  %p540_p3 = pneg %p753_p0 }
  0x18   : > { %s543_s21 = scalar_lea.hbm %s892_s0, 8192  ;;  %p544_p4 = scmp.lt.u32.totalorder %s747_s6, %s892_s0 }
  0x19   : > { %p541_p5 = pnand %p540_p3, %p539_p2  ;;  %p545_p7 = scmp.lt.u32.totalorder %s543_s21, %s538_s11 }
  0x1a   : > { %p547_p13 = scmp.lt.u32.totalorder %s538_s11, %s747_s6 }
  0x1b   : > { %p542_p6 = pneg %p541_p5  ;;  %p546_p10 = por %p545_p7, %p544_p4 }
  0x1d   : > { %p548_p12 = por %p547_p13, %p546_p10 }
  0x1f   : > { %p549_p1 = pnand %p548_p12, %p542_p6 }
  0x21   : > { %552 = shalt.err (!%p549_p1)
}
  0x22   : > { %s553_s28 = scalar_lea.vmem %s749_s8, 4096  ;;  %s652_s29 = smov [#allocation2]  }
  0x23   : > { %p554_p2 = scmp.ne.s32.totalorder %s749_s8, %s553_s28  ;;  %s558_s30 = sshll.u32 %s652_s29, 4  ;;  %s559_s30 = int_to_ptr.vmem [resolvable:$false] %s558_s30 }
  0x24   : > { %s560_s4 = scalar_lea.vmem %s559_s30, 8192  ;;  %p561_p9 = scmp.lt.s32.totalorder %s749_s8, %s559_s30 }
  0x25   : > { %p556_p5 = pnand %p554_p2, %p540_p3  ;;  %p562_p4 = scmp.lt.s32.totalorder %s560_s4, %s553_s28 }
  0x27   : > { %p557_p11 = pneg %p556_p5  ;;  %p563_p7 = por %p562_p4, %p561_p9 }
  0x29   : > { %p564_p10 = pnand %p563_p7, %p557_p11 }
  0x2b   : > { %567 = shalt.err (!%p564_p10)
}
  0x2c   : > { %s653_s5 = smov 256   ;;  %s654_s7 = smov 16  }
  0x2d   : > { %478 = dma.hbm_to_vmem [thread:$0]  (!%p753_p0), %s747_s6, 4096, %s749_s8, %s758_s10, %s653_s5, %s653_s5, %s654_s7  }
  0x2e   : > { %p174_p12 = scmp.lt.s32.totalorder %s650_s17, 3  ;;  %p902_p1 = scmp.ge.s32.totalorder %s650_s17, 1 }
  0x30   : > { %p175_p3 = pnand %p902_p1, %p174_p12 }
  0x31   : > { %s790_s11 = sand.u32 (!%p175_p3), 1, %s634_s13  }
  0x32   : > { %178 = sbr.rel (%p175_p3) target bundleno = 322 (0x142), region = 32  ;;  %s430_s18 = sshll.u32 (!%p175_p3), %s790_s11, 8 }
  0x33   : > { %s181_s19 = scalar_lea.sflag (!%p175_p3), [#allocation3], %s790_s11  ;;  %s794_s21 = scalar_lea.vmem (!%p175_p3), [#allocation2], %s430_s18 }
  0x39   : > { %621 = dma.done.wait (%p725_p8), %s181_s19, 4096  }
  0x3a   : > { %623 = vsyncadd (%p725_p8), %s181_s19, 4294963200  ;;  %v655_v0 = vmov 0.0   ;;  %v656_v1 = vmov 0   ;;  %v211_v2 = vld [vmem:[%s794_s21 + $0x8] sm:$0xff]  ;;  %v213_v3 = vld [vmem:[%s794_s21 + $0x18] sm:$0xff]  ;;  %s431_s10 = sshll.u32 %s790_s11, 4 }
  0x3b   : > { %312 = vmatprep.mubr.f32.mxu0 %v655_v0  ;;  %537 = vset.pattern.permute.xlu0 %v656_v1  ;;  %v210_v4 = vld [vmem:[%s794_s21] sm:$0xff]  ;;  %v439_v5 = vpack.c.bf16 %v213_v3, %v211_v2  ;;  %v212_v6 = vld [vmem:[%s794_s21 + $0x10] sm:$0xff]  ;;  %v215_v7 = vld [vmem:[%s794_s21 + $0x28] sm:$0xff]  ;;  %s438_s22 = sshll.u32 %s642_s15, 8  ;;  %s206_s23 = scalar_lea.vmem [#allocation5], %s431_s10 }
  0x3c   : > { %v217_v8 = vld [vmem:[%s794_s21 + $0x38] sm:$0xff]  ;;  %v441_v9 = vpack.c.bf16 %v212_v6, %v210_v4  ;;  %v214_v11 = vld [vmem:[%s794_s21 + $0x20] sm:$0xff]  ;;  %v216_v12 = vld [vmem:[%s794_s21 + $0x30] sm:$0xff]  ;;  %s338_s28 = sshll.u32 %s206_s23, 4  ;;  %s843_s4 = scalar_lea.hbm %s895_s3, %s438_s22  ;;  %s845_s28 = int_to_ptr.vmem [resolvable:$true] %s338_s28 }
  0x3d   : > { %v443_v10 = vpack.c.bf16 %v217_v8, %v215_v7  ;;  %v219_v13 = vld [vmem:[%s794_s21 + $0x48] sm:$0xff]  ;;  %440 = vmatprep.subr.bf16.mxu0 %v439_v5  ;;  %v221_v14 = vld [vmem:[%s794_s21 + $0x58] sm:$0xff]  ;;  %v445_v15 = vpack.c.bf16 %v216_v12, %v214_v11  ;;  %v218_v17 = vld [vmem:[%s794_s21 + $0x40] sm:$0xff]  ;;  %s322_s5 = scalar_lea.sflag [#allocation4], %s790_s11  ;;  %s568_s15 = scalar_lea.vmem %s845_s28, 256 }
  0x3e   : > { %442 = vmatpush1.bf16.msra.mxu0 %v441_v9  ;;  %v447_v16 = vpack.c.bf16 %v221_v14, %v219_v13  ;;  %v220_v18 = vld [vmem:[%s794_s21 + $0x50] sm:$0xff]  ;;  %v223_v19 = vld [vmem:[%s794_s21 + $0x68] sm:$0xff]  ;;  %v225_v20 = vld [vmem:[%s794_s21 + $0x78] sm:$0xff]  ;;  %p569_p8 = scmp.ne.s32.totalorder %s845_s28, %s568_s15  ;;  %p903_p9 = scmp.ne.s32.totalorder %s899_s25, 0 }
  0x3f   : > { %444 = vmatprep.subr.bf16.mxu0 %v443_v10  ;;  %v449_v21 = vpack.c.bf16 %v220_v18, %v218_v17  ;;  %v451_v22 = vpack.c.bf16 %v225_v20, %v223_v19  ;;  %v222_v23 = vld [vmem:[%s794_s21 + $0x60] sm:$0xff]  ;;  %v224_v24 = vld [vmem:[%s794_s21 + $0x70] sm:$0xff]  ;;  %v227_v25 = vld [vmem:[%s794_s21 + $0x88] sm:$0xff]  ;;  %s657_s7 = smov [#allocation5]  }
  0x40   : > { %v229_v26 = vld [vmem:[%s794_s21 + $0x98] sm:$0xff]  ;;  %v242_v27 = vld [vmem:[%s894_s2] sm:$0xff]  ;;  %v453_v28 = vpack.c.bf16 %v224_v24, %v222_v23  ;;  %v228_v31 = vld [vmem:[%s794_s21 + $0x90] sm:$0xff]  ;;  %p570_p11 = pnand %p569_p8, %p903_p9  ;;  %s572_s18 = sshll.u32 %s657_s7, 4  ;;  %s573_s18 = int_to_ptr.vmem [resolvable:$false] %s572_s18 }
  0x41   : > { %245 = vperm.xlu0 %537, %v242_v27   ;;  %v455_v29 = vpack.c.bf16 %v229_v26, %v227_v25  ;;  %v226_v30 = vld [vmem:[%s794_s21 + $0x80] sm:$0xff]  ;;  %v231_v32 = vld [vmem:[%s794_s21 + $0xa8] sm:$0xff]  ;;  %v233_v33 = vld [vmem:[%s794_s21 + $0xb8] sm:$0xff]  ;;  %s574_s19 = scalar_lea.vmem %s573_s18, 512  ;;  %p575_p6 = scmp.lt.s32.totalorder %s845_s28, %s573_s18 }
  0x42   : > { %446 = vmatpush1.bf16.msra.mxu0 %v445_v15  ;;  %v457_v34 = vpack.c.bf16 %v228_v31, %v226_v30  ;;  %v459_v35 = vpack.c.bf16 %v233_v33, %v231_v32  ;;  %v230_v36 = vld [vmem:[%s794_s21 + $0xa0] sm:$0xff]  ;;  %v232_v37 = vld [vmem:[%s794_s21 + $0xb0] sm:$0xff]  ;;  %v235_v38 = vld [vmem:[%s794_s21 + $0xc8] sm:$0xff]  ;;  %p571_p0 = pneg %p570_p11  ;;  %p576_p13 = scmp.lt.s32.totalorder %s574_s19, %s568_s15 }
  0x43   : > { %448 = vmatprep.subr.bf16.mxu0 %v447_v16  ;;  %v237_v39 = vld [vmem:[%s794_s21 + $0xd8] sm:$0xff]  ;;  %v461_v40 = vpack.c.bf16 %v232_v37, %v230_v36  ;;  %v234_v42 = vld [vmem:[%s794_s21 + $0xc0] sm:$0xff]  ;;  %v236_v43 = vld [vmem:[%s794_s21 + $0xd0] sm:$0xff] }
  0x44   : > { %v463_v41 = vpack.c.bf16 %v237_v39, %v235_v38  ;;  %v239_v44 = vld [vmem:[%s794_s21 + $0xe8] sm:$0xff]  ;;  %v241_v45 = vld [vmem:[%s794_s21 + $0xf8] sm:$0xff]  ;;  %v465_v46 = vpack.c.bf16 %v236_v43, %v234_v42  ;;  %v238_v48 = vld [vmem:[%s794_s21 + $0xe0] sm:$0xff]  ;;  %p577_p2 = por %p576_p13, %p575_p6 }
  0x45   : > { %v467_v47 = vpack.c.bf16 %v241_v45, %v239_v44  ;;  %v240_v49 = vld [vmem:[%s794_s21 + $0xf0] sm:$0xff]  ;;  %v209_v51 = vld [vmem:[%s893_s1] sm:$0xff] }
  0x46   : > { %450 = vmatpush1.bf16.msra.mxu0 %v449_v21  ;;  %v469_v50 = vpack.c.bf16 %v240_v49, %v238_v48  ;;  %p578_p5 = pnand %p577_p2, %p571_p0 }
  0x47   : > { %452 = vmatprep.subr.bf16.mxu0 %v451_v22 }
  0x4a   : > { %454 = vmatpush1.bf16.msra.mxu0 %v453_v28 }
  0x4b   : > { %456 = vmatprep.subr.bf16.mxu0 %v455_v29 }
  0x4e   : > { %458 = vmatpush1.bf16.msra.mxu0 %v457_v34 }
  0x4f   : > { %460 = vmatprep.subr.bf16.mxu0 %v459_v35 }
  0x52   : > { %462 = vmatpush1.bf16.msra.mxu0 %v461_v40 }
  0x53   : > { %464 = vmatprep.subr.bf16.mxu0 %v463_v41 }
  0x56   : > { %466 = vmatpush1.bf16.msra.mxu0 %v465_v46 }
  0x57   : > { %468 = vmatprep.subr.bf16.mxu0 %v467_v47 }
  0x5a   : > { %470 = vmatpush1.bf16.msra.mxu0 %v469_v50 }
  0x5d   : > { %313 = vmatmul.mubr.f32.vlgmr.msra.gmra.mrb[0].mxu0 %v209_v51 }
  0xc0   : > { %v246_v52 = vpop.permute.xlu0 %245 }
 0x130   : > { %v314_v53 = vpop.f32.mrb[0].mxu0 }
 0x131   : > { %v315_v54 = vadd.f32 %v314_v53, %v246_v52  ;;  %v316_v55 = vpop.f32.mrb[1].mxu0 }
 0x132   : > { %v317_v56 = vadd.f32 %v316_v55, %v246_v52 }
 0x133   : > { %319 = vst [vmem:[%s206_s23] sm:$0xff] %v315_v54 }
 0x134   : > { %320 = vst [vmem:[%s206_s23 + $0x8] sm:$0xff] %v317_v56 }
 0x135   : > { %581 = shalt.err (!%p578_p5)
}
 0x136   : > { %s582_s11 = scalar_lea.hbm %s843_s4, 256  ;;  %s586_s6 = scalar_lea.hbm %s895_s3, 512 }
 0x137   : > { %p583_p4 = scmp.ne.s32.totalorder %s843_s4, %s582_s11  ;;  %p587_p12 = scmp.lt.u32.totalorder %s843_s4, %s895_s3 }
 0x138   : > { %p588_p1 = scmp.lt.u32.totalorder %s586_s6, %s582_s11  ;;  %p590_p8 = scmp.lt.u32.totalorder %s582_s11, %s843_s4 }
 0x139   : > { %p584_p7 = pnand %p583_p4, %p903_p9 }
 0x13a   : > { %p589_p3 = por %p588_p1, %p587_p12 }
 0x13b   : > { %p585_p10 = pneg %p584_p7 }
 0x13c   : > { %p591_p11 = por %p590_p8, %p589_p3 }
 0x13e   : > { %p592_p0 = pnand %p591_p11, %p585_p10 }
 0x140   : > { %595 = shalt.err (!%p592_p0)
}
 0x141   : > { %473 = dma.vmem_to_hbm [thread:$0]  (%p903_p9), %s845_s28, 256, %s843_s4, %s322_s5  }
 0x142 PF: > { %s350_s10 = sand.u32 1, %s630_s12   ;;  %p904_p6 = scmp.ne.s32.totalorder %s900_s27, 0 }
 0x143   : > { %p905_p13 = scmp.ge.s32.totalorder %s650_s17, 2  ;;  %s351_s22 = scalar_lea.sflag [#allocation4], %s350_s10 }
 0x145   : > { %p480_p2 = pnand %p905_p13, %p904_p6 }
 0x147   : > { %625 = dma.done.wait (!%p480_p2), %s351_s22, 256  }
 0x148   : > { %627 = vsyncadd (!%p480_p2), %s351_s22, 4294967040  ;;  %s19_s17 = sadd.s32 1, %s650_s17   ;;  %s906_s12 = smov %s634_s13 }
 0x149   : > { %p16_p5 = scmp.ge.s32.totalorder %s19_s17, 4   ;;  %s907_s13 = smov %s638_s14 }
 0x14a   : > { %s908_s14 = smov %s734_s26  ;;  %s909_s15 = smov %s646_s16 }
 0x14b   : > { %s910_s16 = smov %s912_s20  ;;  %18 = sbr.rel (!%p16_p5) target bundleno = 6 (0x6), region = 77 }
 0x152   :  { %356 = vsyncpa [#allocation3], 1 }
 0x153   :  { %358 = vsyncpa [#allocation3 + $0x1], 1 }
 0x154   :  { %359 = vsyncpa [#allocation4], 1 }
 0x155   :  { %361 = vsyncpa [#allocation4 + $0x1], 1 }

</bundles_post_ra>
